<compile_context>
chip_gen: v5e
topology: v5e:2x2
jax: 0.10.0
libtpu: 0.0.40
codegen_flags: <defaults>
</compile_context>

<pallas_src>
import math

import jax
import jax.numpy as jnp
from jax.experimental import pallas as pl
from jax.experimental.pallas import tpu as pltpu

_SMOOTH = 1e-6
_LANES = 128
_SUBLANES = 8
_CHUNK_ROWS = 64          # (64,128) f32 chunk = 8 vregs per operand: safe vreg pressure
_MAX_BLOCK_ROWS = 2048    # (2048,128) f32 block = 1 MiB per input per pipeline buffer


def _tensorcores_per_device() -> int:
    """Best-effort TensorCore count per JAX device (2 on v7x, 1 on v5e/v6e)."""
    try:
        kind = jax.devices()[0].device_kind.lower().replace(" ", "")
    except Exception:
        return 1
    if "v7" in kind or "tpu7" in kind:
        return 2
    return 1


def _make_bce_kernel(n_valid, block_rows, chunk_rows):
    block_elems = block_rows * _LANES
    chunk_elems = chunk_rows * _LANES
    n_chunks = block_rows // chunk_rows
    unroll = True if n_chunks <= 8 else None

    def kernel(yp_ref, yt_ref, out_ref):
        c = pl.program_id(0)           # TensorCore split
        i = pl.program_id(1)           # streaming step within the split
        steps = pl.num_programs(1)

        @pl.when(i == 0)
        def _():
            out_ref[...] = jnp.zeros_like(out_ref)

        gb = c * steps + i             # logical (unclamped) global block index
        block_start = gb * block_elems
        is_full = block_start + block_elems <= n_valid

        def chunk_term(j):
            r = pl.multiple_of(j * chunk_rows, chunk_rows)
            yp = yp_ref[pl.ds(r, chunk_rows), :].astype(jnp.float32)
            yt = yt_ref[pl.ds(r, chunk_rows), :].astype(jnp.float32)
            log_p = jnp.log(yp + _SMOOTH)          # log(y_pred + eps)
            log_q = jnp.log(1.0 - yp + _SMOOTH)    # log(1 - y_pred + eps)
            # yt*log_p + (1-yt)*log_q  ==  yt*(log_p - log_q) + log_q  (one fewer mul)
            return yt * (log_p - log_q) + log_q

        def fold(t):
            # Lane-dense fold of a (chunk_rows,128) chunk into (8,128): VALU-only adds.
            return jnp.sum(t.reshape(chunk_rows // _SUBLANES, _SUBLANES, _LANES), axis=0)

        init = jnp.zeros((_SUBLANES, _LANES), jnp.float32)

        # Fast path: block fully inside the valid range -> no masking work.
        @pl.when(is_full)
        def _():
            def body(j, acc):
                return acc + fold(chunk_term(j))
            out_ref[...] += jax.lax.fori_loop(0, n_chunks, body, init, unroll=unroll)

        # Slow path: block straddles (or lies past) the valid range -> mask per chunk.
        # NOTE: keep jnp.where (select semantics) -- garbage / padded values may flow
        # through jnp.log as NaN/Inf before being discarded; multiplicative masking
        # would break.
        @pl.when(jnp.logical_not(is_full))
        def _():
            rows_iota = jax.lax.broadcasted_iota(jnp.int32, (chunk_rows, _LANES), 0)
            cols_iota = jax.lax.broadcasted_iota(jnp.int32, (chunk_rows, _LANES), 1)
            local_idx = rows_iota * _LANES + cols_iota      # index within one chunk
            limit0 = n_valid - block_start                  # may be negative if fully OOB

            def body(j, acc):
                lim = limit0 - j * chunk_elems
                t = jnp.where(local_idx < lim, chunk_term(j), 0.0)
                return acc + fold(t)

            out_ref[...] += jax.lax.fori_loop(0, n_chunks, body, init, unroll=unroll)

    return kernel


def b_crossentry(y_pred, y_true):
    """Pallas TPU implementation of B_crossentry.forward; returns a () float32 scalar.

    Inputs keep their incoming dtype for the HBM->VMEM stream (cast to f32 happens in
    VMEM), so feeding bf16 y_pred / y_true halves HBM traffic on this bandwidth-bound
    reduction.
    """
    assert y_pred.shape == y_true.shape
    n_elems = int(math.prod(y_pred.shape))
    assert n_elems > 0

    yp = jnp.ravel(y_pred)
    yt = jnp.ravel(y_true)

    # Pad to a whole number of (64,128) chunk tiles (<= 8191 extra elements, masked
    # in-kernel).  Since the block size is a multiple of 64 rows this never adds an
    # extra grid block.
    tile_elems = _CHUNK_ROWS * _LANES
    n_padded = -(-n_elems // tile_elems) * tile_elems
    pad = n_padded - n_elems
    if pad:
        yp = jnp.pad(yp, (0, pad))
        yt = jnp.pad(yt, (0, pad))

    rows = n_padded // _LANES                      # multiple of _CHUNK_ROWS
    yp2d = yp.reshape(rows, _LANES)
    yt2d = yt.reshape(rows, _LANES)

    block_rows = min(_MAX_BLOCK_ROWS, rows)        # multiple of _CHUNK_ROWS
    block_elems = block_rows * _LANES
    blocks_total = -(-rows // block_rows)
    # In-kernel index math is int32: keep the largest logical block offset in range.
    assert (blocks_total + 1) * block_elems < 2 ** 31, "input too large for int32 index math"

    # Adaptive core split: never emit a duplicate pass on 1-TC chips or for
    # single-block inputs.
    splits = max(1, min(_tensorcores_per_device(), blocks_total))
    steps = -(-blocks_total // splits)
    last_block = blocks_total - 1

    def in_map(c, i):
        # Grid points past the last real block (only when blocks_total is odd and
        # splits == 2) re-read the last block; their *logical* element range lies
        # entirely past n_elems, so the in-kernel mask zeroes their contribution.
        return jnp.minimum(c * steps + i, last_block), 0

    if splits > 1:
        # Genuinely shard the split axis across TensorCores (v7x).
        first_axis = getattr(pltpu, "CORE_PARALLEL", "parallel")
    else:
        first_axis = "arbitrary"

    out = pl.pallas_call(
        _make_bce_kernel(n_elems, block_rows, _CHUNK_ROWS),
        out_shape=jax.ShapeDtypeStruct((splits * _SUBLANES, _LANES), jnp.float32),
        grid_spec=pltpu.PrefetchScalarGridSpec(
            num_scalar_prefetch=0,
            grid=(splits, steps),
            in_specs=[
                pl.BlockSpec((block_rows, _LANES), in_map),
                pl.BlockSpec((block_rows, _LANES), in_map),
            ],
            out_specs=pl.BlockSpec((_SUBLANES, _LANES), lambda c, i: (c, 0)),
        ),
        compiler_params=pltpu.CompilerParams(
            dimension_semantics=(first_axis, "arbitrary"),
        ),
    )(yp2d, yt2d)

    # Single cross-lane reduction of the tiny (splits*8, 128) partial-sum slab,
    # then mean + negate.
    return -jnp.sum(out) / jnp.float32(n_elems)


def _reference(y_pred, y_true):
    return -jnp.mean(
        y_true * jnp.log(y_pred + _SMOOTH)
        + (1.0 - y_true) * jnp.log(1.0 - y_pred + _SMOOTH)
    )


if __name__ == "__main__":
    key = jax.random.PRNGKey(0)

    checks = [
        (2, 4, 16, 16),    # lane-aligned NCHW-like case (2048 elements), single block
        (3, 5, 7),         # tiny input, far smaller than one chunk tile
        (6, 5, 100, 9),    # 27000 elements: masked tail inside a single block
        (5, 8, 96, 96),    # 368640 elements: multi-block streaming (+ core split on v7x)
    ]

    for idx, shape in enumerate(checks):
        kp, kt = jax.random.split(jax.random.fold_in(key, idx))
        y_pred = jax.random.uniform(kp, shape, jnp.float32, 0.01, 0.99)
        y_true = (jax.random.uniform(kt, shape, jnp.float32) > 0.5).astype(jnp.float32)

        loss = jax.block_until_ready(b_crossentry(y_pred, y_true))
        ref = _reference(y_pred, y_true)
        assert jnp.allclose(loss, ref, rtol=5e-5, atol=1e-6), (shape, loss, ref)

    # bf16 activations halve HBM traffic on this HBM-bound kernel; check that path too.
    kp, kt = jax.random.split(jax.random.fold_in(key, 99))
    y_pred = jax.random.uniform(kp, (2, 4, 16, 16), jnp.float32, 0.01, 0.99).astype(jnp.bfloat16)
    y_true = (jax.random.uniform(kt, (2, 4, 16, 16), jnp.float32) > 0.5).astype(jnp.float32)
    loss = jax.block_until_ready(b_crossentry(y_pred, y_true))
    ref = _reference(y_pred.astype(jnp.float32), y_true)
    assert jnp.allclose(loss, ref, rtol=5e-5, atol=1e-6), (loss, ref)

    print("KERNEL_OK")
</pallas_src>

<mosaic_0001>
module attributes {stable_mosaic.version = 11 : i64} {
  func.func @kernel(%arg0: i32, %arg1: i32, %arg2: memref<64x128xf32, #tpu.memory_space<vmem>>, %arg3: memref<64x128xf32, #tpu.memory_space<vmem>>, %arg4: memref<8x128xf32, #tpu.memory_space<vmem>>) attributes {dimension_semantics = [#tpu.dimension_semantics<arbitrary>, #tpu.dimension_semantics<arbitrary>], iteration_bounds = array<i64: 1, 1>, scalar_prefetch = 0 : i64, scratch_operands = 0 : i64, tpu.core_type = #tpu.core_type<tc>, window_params = [{transform_indices = @transform_0, window_bounds = array<i64: 64, 128>}, {transform_indices = @transform_1, window_bounds = array<i64: 64, 128>}, {transform_indices = @transform_2, window_bounds = array<i64: 8, 128>}]} {
    %c0_i32 = arith.constant 0 : i32
    %0 = arith.cmpi eq, %arg1, %c0_i32 : i32
    %1 = arith.extui %0 : i1 to i32
    %c0_i32_0 = arith.constant 0 : i32
    %2 = arith.cmpi ne, %1, %c0_i32_0 : i32
    scf.if %2 {
      %cst_4 = arith.constant 0.000000e+00 : f32
      %14 = vector.broadcast %cst_4 : f32 to vector<8x128xf32>
      %c0 = arith.constant 0 : index
      %c0_5 = arith.constant 0 : index
      %15 = vector.load %arg4[%c0, %c0_5] : memref<8x128xf32, #tpu.memory_space<vmem>>, vector<8x128xf32>
      tpu.vector_store %arg4[%c0, %c0_5], %14 {strides = array<i32>} : memref<8x128xf32, #tpu.memory_space<vmem>>, vector<8x128xf32>,
    } else {
    }
    %c1_i32 = arith.constant 1 : i32
    %3 = arith.muli %arg0, %c1_i32 : i32
    %4 = arith.addi %3, %arg1 : i32
    %c8192_i32 = arith.constant 8192 : i32
    %5 = arith.muli %4, %c8192_i32 : i32
    %c8192_i32_1 = arith.constant 8192 : i32
    %6 = arith.addi %5, %c8192_i32_1 : i32
    %c2048_i32 = arith.constant 2048 : i32
    %7 = arith.cmpi sle, %6, %c2048_i32 : i32
    %cst = arith.constant 0.000000e+00 : f32
    %8 = vector.broadcast %cst : f32 to vector<8x128xf32>
    %9 = arith.extui %7 : i1 to i32
    %c0_i32_2 = arith.constant 0 : i32
    %10 = arith.cmpi ne, %9, %c0_i32_2 : i32
    scf.if %10 {
      %c0 = arith.constant 0 : index
      %c0_4 = arith.constant 0 : index
      %14 = vector.load %arg4[%c0, %c0_4] : memref<8x128xf32, #tpu.memory_space<vmem>>, vector<8x128xf32>
      %c0_i32_5 = arith.constant 0 : i32
      %c64_i32 = arith.constant 64 : i32
      %15 = arith.muli %c0_i32_5, %c64_i32 : i32
      %16 = tpu.assume_multiple %15, 64 : i32
      %17 = arith.index_cast %16 : i32 to index
      %c0_6 = arith.constant 0 : index
      %18 = vector.load %arg2[%17, %c0_6] : memref<64x128xf32, #tpu.memory_space<vmem>>, vector<64x128xf32>
      %19 = arith.index_cast %16 : i32 to index
      %c0_7 = arith.constant 0 : index
      %20 = vector.load %arg3[%19, %c0_7] : memref<64x128xf32, #tpu.memory_space<vmem>>, vector<64x128xf32>
      %cst_8 = arith.constant 9.99999997E-7 : f32
      %21 = vector.broadcast %cst_8 : f32 to vector<64x128xf32>
      %22 = arith.addf %18, %21 : vector<64x128xf32>
      %23 = math.log %22 : vector<64x128xf32>
      %cst_9 = arith.constant 1.000000e+00 : f32
      %24 = vector.broadcast %cst_9 : f32 to vector<64x128xf32>
      %25 = arith.subf %24, %18 : vector<64x128xf32>
      %cst_10 = arith.constant 9.99999997E-7 : f32
      %26 = vector.broadcast %cst_10 : f32 to vector<64x128xf32>
      %27 = arith.addf %25, %26 : vector<64x128xf32>
      %28 = math.log %27 : vector<64x128xf32>
      %29 = arith.subf %23, %28 : vector<64x128xf32>
      %30 = arith.mulf %20, %29 : vector<64x128xf32>
      %31 = arith.addf %30, %28 : vector<64x128xf32>
      %32 = vector.shape_cast %31 : vector<64x128xf32> to vector<8x8x128xf32>
      %cst_11 = arith.constant dense<0.000000e+00> : vector<8x128xf32>
      %33 = vector.multi_reduction <add>, %32, %cst_11 [0] : vector<8x8x128xf32> to vector<8x128xf32>
      %34 = arith.addf %8, %33 : vector<8x128xf32>
      %c1_i32_12 = arith.constant 1 : i32
      %35 = arith.addf %14, %34 : vector<8x128xf32>
      %c0_13 = arith.constant 0 : index
      %c0_14 = arith.constant 0 : index
      %36 = vector.load %arg4[%c0_13, %c0_14] : memref<8x128xf32, #tpu.memory_space<vmem>>, vector<8x128xf32>
      tpu.vector_store %arg4[%c0_13, %c0_14], %35 {strides = array<i32>} : memref<8x128xf32, #tpu.memory_space<vmem>>, vector<8x128xf32>,
    } else {
    }
    %true = arith.constant true
    %11 = arith.xori %7, %true : i1
    %12 = arith.extui %11 : i1 to i32
    %c0_i32_3 = arith.constant 0 : i32
    %13 = arith.cmpi ne, %12, %c0_i32_3 : i32
    scf.if %13 {
      %14 = tpu.iota {dimensions = array<i32: 0>} : vector<64x128xi32>
      %15 = tpu.iota {dimensions = array<i32: 1>} : vector<64x128xi32>
      %c128_i32 = arith.constant 128 : i32
      %16 = vector.broadcast %c128_i32 : i32 to vector<64x128xi32>
      %17 = arith.muli %14, %16 : vector<64x128xi32>
      %18 = arith.addi %17, %15 : vector<64x128xi32>
      %c2048_i32_4 = arith.constant 2048 : i32
      %19 = arith.subi %c2048_i32_4, %5 : i32
      %c0 = arith.constant 0 : index
      %c0_5 = arith.constant 0 : index
      %20 = vector.load %arg4[%c0, %c0_5] : memref<8x128xf32, #tpu.memory_space<vmem>>, vector<8x128xf32>
      %c0_i32_6 = arith.constant 0 : i32
      %c8192_i32_7 = arith.constant 8192 : i32
      %21 = arith.muli %c0_i32_6, %c8192_i32_7 : i32
      %22 = arith.subi %19, %21 : i32
      %23 = vector.broadcast %22 : i32 to vector<64x128xi32>
      %24 = arith.cmpi slt, %18, %23 : vector<64x128xi32>
      %c64_i32 = arith.constant 64 : i32
      %25 = arith.muli %c0_i32_6, %c64_i32 : i32
      %26 = tpu.assume_multiple %25, 64 : i32
      %27 = arith.index_cast %26 : i32 to index
      %c0_8 = arith.constant 0 : index
      %28 = vector.load %arg2[%27, %c0_8] : memref<64x128xf32, #tpu.memory_space<vmem>>, vector<64x128xf32>
      %29 = arith.index_cast %26 : i32 to index
      %c0_9 = arith.constant 0 : index
      %30 = vector.load %arg3[%29, %c0_9] : memref<64x128xf32, #tpu.memory_space<vmem>>, vector<64x128xf32>
      %cst_10 = arith.constant 9.99999997E-7 : f32
      %31 = vector.broadcast %cst_10 : f32 to vector<64x128xf32>
      %32 = arith.addf %28, %31 : vector<64x128xf32>
      %33 = math.log %32 : vector<64x128xf32>
      %cst_11 = arith.constant 1.000000e+00 : f32
      %34 = vector.broadcast %cst_11 : f32 to vector<64x128xf32>
      %35 = arith.subf %34, %28 : vector<64x128xf32>
      %cst_12 = arith.constant 9.99999997E-7 : f32
      %36 = vector.broadcast %cst_12 : f32 to vector<64x128xf32>
      %37 = arith.addf %35, %36 : vector<64x128xf32>
      %38 = math.log %37 : vector<64x128xf32>
      %39 = arith.subf %33, %38 : vector<64x128xf32>
      %40 = arith.mulf %30, %39 : vector<64x128xf32>
      %41 = arith.addf %40, %38 : vector<64x128xf32>
      %cst_13 = arith.constant 0.000000e+00 : f32
      %42 = vector.broadcast %cst_13 : f32 to vector<64x128xf32>
      %43 = arith.select %24, %41, %42 : vector<64x128xi1>, vector<64x128xf32>
      %44 = vector.shape_cast %43 : vector<64x128xf32> to vector<8x8x128xf32>
      %cst_14 = arith.constant dense<0.000000e+00> : vector<8x128xf32>
      %45 = vector.multi_reduction <add>, %44, %cst_14 [0] : vector<8x8x128xf32> to vector<8x128xf32>
      %46 = arith.addf %8, %45 : vector<8x128xf32>
      %c1_i32_15 = arith.constant 1 : i32
      %47 = arith.addf %20, %46 : vector<8x128xf32>
      %c0_16 = arith.constant 0 : index
      %c0_17 = arith.constant 0 : index
      %48 = vector.load %arg4[%c0_16, %c0_17] : memref<8x128xf32, #tpu.memory_space<vmem>>, vector<8x128xf32>
      tpu.vector_store %arg4[%c0_16, %c0_17], %47 {strides = array<i32>} : memref<8x128xf32, #tpu.memory_space<vmem>>, vector<8x128xf32>,
    } else {
    }
    return
  }
  func.func @transform_0(%arg0: i32, %arg1: i32) -> (i32, i32) {
    %c1_i32 = arith.constant 1 : i32
    %0 = arith.muli %arg0, %c1_i32 : i32
    %1 = arith.addi %0, %arg1 : i32
    %c0_i32 = arith.constant 0 : i32
    %2 = arith.minsi %1, %c0_i32 : i32
    %c0_i32_0 = arith.constant 0 : i32
    %c0_i32_1 = arith.constant 0 : i32
    return %2, %c0_i32_0 : i32, i32
  }
  func.func @transform_1(%arg0: i32, %arg1: i32) -> (i32, i32) {
    %c1_i32 = arith.constant 1 : i32
    %0 = arith.muli %arg0, %c1_i32 : i32
    %1 = arith.addi %0, %arg1 : i32
    %c0_i32 = arith.constant 0 : i32
    %2 = arith.minsi %1, %c0_i32 : i32
    %c0_i32_0 = arith.constant 0 : i32
    %c0_i32_1 = arith.constant 0 : i32
    return %2, %c0_i32_0 : i32, i32
  }
  func.func @transform_2(%arg0: i32, %arg1: i32) -> (i32, i32) {
    %c0_i32 = arith.constant 0 : i32
    %c0_i32_0 = arith.constant 0 : i32
    return %arg0, %c0_i32 : i32, i32
  }
}

</mosaic_0001>

<bundles_post_ra>
// kernel: tpu_custom_call.1
= control target key start
LH: loop header
LB: loop body
LE: loop exit
PB: predicated region body
PF: predicated region fallthrough
CT: control target
= control target key end

     0   :  { %7 = vsyncpa [#allocation3], 0  ;;  %s562_s0 = inlined_call_operand.hbm [shape: f32[64,128], index: 0, kind: input, shape index: {}]   ;;  %s563_s1 = inlined_call_operand.hbm [shape: f32[64,128], index: 1, kind: input, shape index: {}]   ;;  %s564_s2 = inlined_call_operand.hbm [shape: f32[8,128], index: 2, kind: output, shape index: {}]  }
   0x1   :  { %8 = vsyncpa [#allocation6], 0 }
   0x2   :  { %9 = vsyncpa [#allocation4], 0  ;;  %s20_s11 = sshll.u32 %s562_s0, 4  ;;  %s477_s12 = smov [#allocation2]   ;;  %s21_s11 = int_to_ptr.hbm [resolvable:$true] %s20_s11 }
   0x3   :  { %s22_s13 = sshll.u32 %s477_s12, 4  ;;  %s39_s16 = sshll.u32 %s563_s1, 4  ;;  %s23_s13 = int_to_ptr.vmem [resolvable:$true] %s22_s13  ;;  %s40_s16 = int_to_ptr.hbm [resolvable:$true] %s39_s16 }
   0x4   :  { %s478_s17 = smov 128   ;;  %s479_s18 = smov 8  }
   0x5   :  { %28 = dma.hbm_to_vmem [thread:$0]  %s21_s11, 1024, %s23_s13, [#allocation3], %s478_s17, %s478_s17, %s479_s18  }
   0x6   :  { %s480_s19 = smov [#allocation5]  }
   0x7   :  { %s41_s20 = sshll.u32 %s480_s19, 4  ;;  %s42_s20 = int_to_ptr.vmem [resolvable:$true] %s41_s20 }
   0x8   :  { %47 = dma.hbm_to_vmem [thread:$0]  %s40_s16, 1024, %s42_s20, [#allocation6], %s478_s17, %s478_s17, %s479_s18  }
   0x9   :  { %471 = dma.done.wait [#allocation3], 1024  }
   0xa   :  { %472 = vsyncadd [#allocation3], 4294966272 }
   0xb   :  { %473 = dma.done.wait [#allocation6], 1024  }
   0xc   :  { %474 = vsyncadd [#allocation6], 4294966272  ;;  %v187_v0 = vlaneseq  ;;  %v225_v2 = vld [vmem:[#allocation2] sm:$0xff]  ;;  %v226_v3 = vld [vmem:[#allocation2 + $0x8] sm:$0xff]  ;;  %s481_s0 = smov [#allocation7]   ;;  %s346_s23 = sshll.u32 %s564_s2, 4  ;;  %s347_s23 = int_to_ptr.hbm [resolvable:$true] %s346_s23 }
   0xd   :  { %v227_v4 = vld [vmem:[#allocation2 + $0x10] sm:$0xff]  ;;  %v228_v5 = vld [vmem:[#allocation2 + $0x18] sm:$0xff]  ;;  %v241_v6 = vadd.f32 1e-06, %v225_v2  ;;  %v242_v7 = vadd.f32 1e-06, %v226_v3 }
   0xe   :  { %v503_v1 = vshrl.u32 %v187_v0, 7  ;;  %v505_v8 = vand.u32 127, %v187_v0  ;;  %v229_v9 = vld [vmem:[#allocation2 + $0x20] sm:$0xff]  ;;  %v243_v10 = vadd.f32 1e-06, %v227_v4  ;;  %v230_v14 = vld [vmem:[#allocation2 + $0x28] sm:$0xff] }
   0xf   :  { %v244_v11 = vadd.f32 1e-06, %v228_v5  ;;  %v245_v15 = vadd.f32 1e-06, %v229_v9  ;;  %367 = vlog2.f32 %v241_v6  ;;  %v231_v16 = vld [vmem:[#allocation2 + $0x30] sm:$0xff]  ;;  %v265_v18 = vsub.f32 1.0, %v225_v2 }
  0x10   :  { %v189_v12 = vadd.s32 8, %v503_v1  ;;  %v190_v13 = vadd.s32 16, %v503_v1  ;;  %v246_v17 = vadd.f32 1e-06, %v230_v14  ;;  %369 = vlog2.f32 %v242_v7  ;;  %v232_v21 = vld [vmem:[#allocation2 + $0x38] sm:$0xff]  ;;  %s344_s1 = sshll.u32 %s481_s0, 4  ;;  %s345_s1 = int_to_ptr.vmem [resolvable:$true] %s344_s1 }
  0x11   :  { %v266_v19 = vsub.f32 1.0, %v226_v3  ;;  %v191_v20 = vadd.s32 24, %v503_v1  ;;  %v247_v22 = vadd.f32 1e-06, %v231_v16  ;;  %371 = vlog2.f32 %v243_v10 }
  0x12   :  { %v267_v23 = vsub.f32 1.0, %v227_v4  ;;  %v192_v24 = vadd.s32 32, %v503_v1  ;;  %v248_v25 = vadd.f32 1e-06, %v232_v21  ;;  %373 = vlog2.f32 %v244_v11 }
  0x13   :  { %v268_v26 = vsub.f32 1.0, %v228_v5  ;;  %v193_v27 = vadd.s32 40, %v503_v1  ;;  %375 = vlog2.f32 %v245_v15  ;;  %v269_v28 = vsub.f32 1.0, %v229_v9  ;;  %v233_v5 = vld [vmem:[#allocation5] sm:$0xff] }
  0x14   :  { %v273_v29 = vadd.f32 1e-06, %v265_v18  ;;  %v194_v30 = vadd.s32 48, %v503_v1  ;;  %377 = vlog2.f32 %v246_v17  ;;  %v270_v31 = vsub.f32 1.0, %v230_v14  ;;  %v235_v18 = vld [vmem:[#allocation5 + $0x10] sm:$0xff] }
  0x15   :  { %v274_v32 = vadd.f32 1e-06, %v266_v19  ;;  %v368_v33 = vpop.eup %367  ;;  %v514_v34 = vadd.s32 56, %v503_v1  ;;  %379 = vlog2.f32 %v247_v22  ;;  %v271_v35 = vsub.f32 1.0, %v231_v16 }
  0x16   :  { %v275_v36 = vadd.f32 1e-06, %v267_v23  ;;  %v370_v37 = vpop.eup %369  ;;  %v198_v38 = vmul.u32 128, %v503_v1  ;;  %381 = vlog2.f32 %v248_v25  ;;  %v272_v39 = vsub.f32 1.0, %v232_v21  ;;  %v236_v23 = vld [vmem:[#allocation5 + $0x18] sm:$0xff] }
  0x17   :  { %v276_v40 = vadd.f32 1e-06, %v268_v26  ;;  %v372_v41 = vpop.eup %371  ;;  %v199_v42 = vmul.u32 128, %v189_v12  ;;  %v200_v43 = vmul.u32 128, %v190_v13  ;;  %v277_v44 = vadd.f32 1e-06, %v269_v28 }
  0x18   :  { %383 = vlog2.f32 %v273_v29  ;;  %v374_v45 = vpop.eup %373  ;;  %v201_v46 = vmul.u32 128, %v191_v20  ;;  %v202_v47 = vmul.u32 128, %v192_v24  ;;  %v278_v48 = vadd.f32 1e-06, %v270_v31  ;;  %v234_v13 = vld [vmem:[#allocation5 + $0x8] sm:$0xff]  ;;  %v237_v29 = vld [vmem:[#allocation5 + $0x20] sm:$0xff] }
  0x19   :  { %385 = vlog2.f32 %v274_v32  ;;  %v376_v49 = vpop.eup %375  ;;  %v203_v50 = vmul.u32 128, %v193_v27  ;;  %v204_v51 = vmul.u32 128, %v194_v30  ;;  %v279_v52 = vadd.f32 1e-06, %v271_v35 }
  0x1a   :  { %387 = vlog2.f32 %v275_v36  ;;  %v378_v53 = vpop.eup %377  ;;  %v518_v54 = vadd.s32 %v198_v38, %v505_v8  ;;  %v280_v55 = vadd.f32 1e-06, %v272_v39  ;;  %v205_v57 = vmul.u32 128, %v514_v34  ;;  %v238_v36 = vld [vmem:[#allocation5 + $0x28] sm:$0xff] }
  0x1b   :  { %389 = vlog2.f32 %v276_v40  ;;  %v380_v56 = vpop.eup %379  ;;  %v522_v58 = vadd.s32 %v199_v42, %v505_v8  ;;  %v525_v59 = vadd.s32 %v200_v43, %v505_v8  ;;  %v528_v61 = vadd.s32 %v201_v46, %v505_v8  ;;  %v240_v46 = vld [vmem:[#allocation5 + $0x38] sm:$0xff] }
  0x1c   :  { %391 = vlog2.f32 %v277_v44  ;;  %v382_v60 = vpop.eup %381  ;;  %v531_v62 = vadd.s32 %v202_v47, %v505_v8  ;;  %v250_v63 = vmul.f32 0.6931472, %v368_v33  ;;  %v534_v1 = vadd.s32 %v203_v50, %v505_v8 }
  0x1d   :  { %393 = vlog2.f32 %v278_v48  ;;  %v537_v2 = vadd.s32 %v204_v51, %v505_v8  ;;  %v252_v3 = vmul.f32 0.6931472, %v370_v37  ;;  %vm217_vm0 = vcmp.lt.s32.totalorder %v518_v54, 2048 }
  0x1e   :  { %v384_v0 = vpop.eup %383  ;;  %395 = vlog2.f32 %v279_v52  ;;  %v254_v6 = vmul.f32 0.6931472, %v372_v41  ;;  %vm218_vm1 = vcmp.lt.s32.totalorder %v522_v58, 2048  ;;  %vm219_vm2 = vcmp.lt.s32.totalorder %v525_v59, 2048  ;;  %v239_v41 = vld [vmem:[#allocation5 + $0x30] sm:$0xff] }
  0x1f   :  { %v386_v4 = vpop.eup %385  ;;  %v282_v7 = vmul.f32 0.6931472, %v384_v0  ;;  %397 = vlog2.f32 %v280_v55  ;;  %v256_v10 = vmul.f32 0.6931472, %v374_v45  ;;  %vm220_vm3 = vcmp.lt.s32.totalorder %v528_v61, 2048 }
  0x20   :  { %v388_v9 = vpop.eup %387  ;;  %v284_v11 = vmul.f32 0.6931472, %v386_v4  ;;  %v258_v14 = vmul.f32 0.6931472, %v376_v49  ;;  %vm221_vm4 = vcmp.lt.s32.totalorder %v531_v62, 2048  ;;  %v213_v54 = vadd.s32 %v205_v57, %v505_v8 }
  0x21   :  { %v390_v12 = vpop.eup %389  ;;  %v286_v15 = vmul.f32 0.6931472, %v388_v9  ;;  %v297_v16 = vsub.f32 %v250_v63, %v282_v7  ;;  %v260_v19 = vmul.f32 0.6931472, %v378_v53  ;;  %v262_v24 = vmul.f32 0.6931472, %v380_v56 }
  0x22   :  { %v392_v17 = vpop.eup %391  ;;  %v288_v20 = vmul.f32 0.6931472, %v390_v12  ;;  %v298_v21 = vsub.f32 %v252_v3, %v284_v11  ;;  %v264_v30 = vmul.f32 0.6931472, %v382_v60  ;;  %vm222_vm5 = vcmp.lt.s32.totalorder %v534_v1, 2048 }
  0x23   :  { %v394_v22 = vpop.eup %393  ;;  %v290_v25 = vmul.f32 0.6931472, %v392_v17  ;;  %v299_v26 = vsub.f32 %v254_v6, %v286_v15  ;;  %v305_v27 = vmul.f32 %v297_v16, %v233_v5  ;;  %vm223_vm6 = vcmp.lt.s32.totalorder %v537_v2, 2048 }
  0x24   :  { %v396_v28 = vpop.eup %395  ;;  %v292_v31 = vmul.f32 0.6931472, %v394_v22  ;;  %v300_v32 = vsub.f32 %v256_v10, %v288_v20  ;;  %v306_v33 = vmul.f32 %v298_v21, %v234_v13  ;;  %vm224_vm7 = vcmp.lt.s32.totalorder %v213_v54, 2048 }
  0x25   :  { %v398_v35 = vpop.eup %397  ;;  %v294_v37 = vmul.f32 0.6931472, %v396_v28  ;;  %v301_v38 = vsub.f32 %v258_v14, %v290_v25  ;;  %v307_v39 = vmul.f32 %v299_v26, %v235_v18  ;;  %v313_v40 = vadd.f32 %v305_v27, %v282_v7 }
  0x26   :  { %v296_v42 = vmul.f32 0.6931472, %v398_v35  ;;  %v302_v43 = vsub.f32 %v260_v19, %v292_v31  ;;  %v308_v44 = vmul.f32 %v300_v32, %v236_v23  ;;  %v314_v45 = vadd.f32 %v306_v33, %v284_v11 }
  0x27   :  { %v303_v47 = vsub.f32 %v262_v24, %v294_v37  ;;  %v309_v48 = vmul.f32 %v301_v38, %v237_v29  ;;  %v315_v49 = vadd.f32 %v307_v39, %v286_v15  ;;  %v321_v50 = vsel %vm217_vm0, %v313_v40, 0.0 }
  0x28   :  { %v304_v51 = vsub.f32 %v264_v30, %v296_v42  ;;  %v310_v52 = vmul.f32 %v302_v43, %v238_v36  ;;  %v316_v53 = vadd.f32 %v308_v44, %v288_v20  ;;  %v322_v55 = vsel %vm218_vm1, %v314_v45, 0.0 }
  0x29   :  { %v311_v56 = vmul.f32 %v303_v47, %v239_v41  ;;  %v317_v60 = vadd.f32 %v309_v48, %v290_v25  ;;  %v323_v63 = vsel %vm219_vm2, %v315_v49, 0.0  ;;  %v329_v0 = vadd.f32 %v322_v55, %v321_v50 }
  0x2a   :  { %v312_v3 = vmul.f32 %v304_v51, %v240_v46  ;;  %v318_v4 = vadd.f32 %v310_v52, %v292_v31  ;;  %v324_v5 = vsel %vm220_vm3, %v316_v53, 0.0 }
  0x2b   :  { %v330_v6 = vadd.f32 %v329_v0, %v323_v63  ;;  %v319_v58 = vadd.f32 %v311_v56, %v294_v37  ;;  %v325_v7 = vsel %vm221_vm4, %v317_v60, 0.0 }
  0x2c   :  { %v320_v9 = vadd.f32 %v312_v3, %v296_v42  ;;  %v326_v10 = vsel %vm222_vm5, %v318_v4, 0.0 }
  0x2d   :  { %v331_v59 = vadd.f32 %v330_v6, %v324_v5  ;;  %v327_v61 = vsel %vm223_vm6, %v319_v58, 0.0 }
  0x2e   :  { %v328_v13 = vsel %vm224_vm7, %v320_v9, 0.0 }
  0x2f   :  { %v332_v11 = vadd.f32 %v331_v59, %v325_v7 }
  0x31   :  { %v333_v12 = vadd.f32 %v332_v11, %v326_v10 }
  0x33   :  { %v334_v14 = vadd.f32 %v333_v12, %v327_v61 }
  0x35   :  { %v335_v8 = vadd.f32 %v334_v14, %v328_v13 }
  0x37   :  { %338 = vst [vmem:[#allocation7] sm:$0xff] %v335_v8 }
  0x38   :  { %349 = dma.vmem_to_hbm [thread:$0]  %s345_s1, 128, %s347_s23, [#allocation4]  }
  0x39   :  { %475 = dma.done.wait [#allocation4], 128  }
  0x3a   :  { %476 = vsyncadd [#allocation4], 4294967168 }
  0x3b   :  { %354 = vsyncpa [#allocation3], 1 }
  0x3c   :  { %355 = vsyncpa [#allocation6], 1 }
  0x3d   :  { %356 = vsyncpa [#allocation4], 1 }

</bundles_post_ra>
